<compile_context>
chip_gen: v6e
topology: v6e:2x2x1
jax: 0.10.0
libtpu: 0.0.40
codegen_flags: <defaults>
</compile_context>

<pallas_src>
import functools
import math

import jax
import jax.numpy as jnp
from jax import lax
from jax.experimental import pallas as pl
from jax.experimental.pallas import tpu as pltpu

LOG2E = math.log2(math.e)  # Python float (wrapper-side only)


def _round_up(a, b):
    return (a + b - 1) // b * b


def _cdiv(a, b):
    return -(-a // b)


def _pad2d(a, rows, cols):
    a = jnp.asarray(a, jnp.float32)
    out = jnp.zeros((rows, cols), jnp.float32)
    return out.at[: a.shape[0], : a.shape[1]].set(a)


def _mine_kernel(batch_size, tile_m, tiles_per_slice, needs_mask,
                 x_ref, yys_ref,
                 w1x_ref, w1y_ref, b1_ref, w2_ref, b2_ref, w3_ref, w3t_ref,
                 b3_ref,
                 o_ref, accj_ref, acce_ref):
    c = pl.program_id(0)   # parallel slice (split across TensorCores where available)
    i = pl.program_id(1)   # row-tile index inside the slice (reduction axis)

    # ---- init the per-slice running sums on the first row tile ----
    @pl.when(i == 0)
    def _():
        accj_ref[...] = jnp.zeros_like(accj_ref)
        acce_ref[...] = jnp.zeros_like(acce_ref)

    f32 = jnp.float32
    mm_dtype = w2_ref.dtype
    hp = w2_ref.shape[0]

    # ---- layer 1 ----
    # x contribution computed ONCE and shared by the joint and marginal heads;
    # y and shuffled_y arrive interleaved as one (2*TM, d_imp) block so their
    # layer-1 contribution is a single matmul.
    xc = jnp.dot(x_ref[...], w1x_ref[...], preferred_element_type=f32)       # (TM, hp)
    yc = jnp.dot(yys_ref[...], w1y_ref[...], preferred_element_type=f32)     # (2TM, hp)
    xcb = xc + b1_ref[...]                                                   # b1 added once
    h1 = jnp.maximum(yc + jnp.concatenate([xcb, xcb], axis=0), 0.0)          # (2TM, hp)

    # ---- layer 2: both heads in one matmul ----
    h2 = jnp.dot(h1.astype(mm_dtype), w2_ref[...],
                 preferred_element_type=f32) + b2_ref[...]
    h2 = jnp.maximum(h2, 0.0)                                                # (2TM, hp)
    h2_joint = h2[:tile_m]                                                   # (TM, hp)
    h2_marg = h2[tile_m:]                                                    # (TM, hp)

    # ---- layer 3: marginal head only (joint W3 is folded into the finalize) ----
    lo_m = (jnp.dot(h2_marg.astype(mm_dtype), w3_ref[...],
                    preferred_element_type=f32)[:, 0:1]
            + b3_ref[0:1, 0:1])                                              # (TM, 1)
    exp_m = jnp.exp(lo_m)

    def accumulate(h2j, em):
        accj_ref[...] += jnp.sum(h2j, axis=0, keepdims=True)                 # (1, hp)
        acce_ref[...] += jnp.sum(em, axis=0, keepdims=True)                  # (1, 1)

    gt = c * tiles_per_slice + i   # global row-tile index
    if needs_mask:
        has_pad = (gt + 1) * tile_m > batch_size

        @pl.when(jnp.logical_not(has_pad))
        def _():
            accumulate(h2_joint, exp_m)

        @pl.when(has_pad)
        def _():
            row = gt * tile_m + lax.broadcasted_iota(jnp.int32, (tile_m, 1), 0)
            valid = row < batch_size
            accumulate(jnp.where(valid, h2_joint, 0.0),
                       jnp.where(valid, exp_m, 0.0))
    else:
        accumulate(h2_joint, exp_m)

    # ---- finalize once per slice: emit the two partial sums ----
    @pl.when(i == pl.num_programs(1) - 1)
    def _():
        # lane 0: sum of joint logits (without b3) = row-sum(h2_joint) @ W3[:,0]
        # lane 1: sum of exp(marginal logits)
        pj = jnp.sum(accj_ref[...] * w3t_ref[...])
        lane = lax.broadcasted_iota(jnp.int32, (1, hp), 1)
        partial = jnp.where(lane == 0, pj,
                            jnp.where(lane == 1, acce_ref[...], 0.0))
        o_ref[...] = partial.reshape(o_ref.shape)


def mine_forward_pallas(e_explicit, e_implicit, params, perm_key, *,
                        tile_rows=None, num_slices=None,
                        compute_dtype=jnp.float32):
    """Forward pass of MINE. Returns a scalar MI estimate (bits)."""
    w1, b1, w2, b2, w3, b3 = params
    batch_size, d_exp = e_explicit.shape
    d_imp = e_implicit.shape[1]
    hidden = w1.shape[1]  # 50

    # ---- glue (plain JAX): permutation of the implicit embeddings ----
    idx = jax.random.permutation(perm_key, batch_size)
    shuffled_y = e_implicit[idx]
    # TODO(synk): fold this gather into the kernel via scalar-prefetched indices.

    # ---- tiling over the batch/row dimension ----
    rows8 = _round_up(batch_size, 8)
    if tile_rows is None:
        tm = min(1024, rows8)
    else:
        tm = max(8, _round_up(tile_rows, 8))
    n_tiles = _cdiv(batch_size, tm)

    # 2-way slice split (v7x: one slice per TensorCore). Only used when the
    # tile count divides evenly so single-core chips do zero extra work.
    if num_slices is None:
        num_slices = 2 if (n_tiles >= 2 and n_tiles % 2 == 0) else 1
    num_slices = max(1, int(num_slices))
    tiles_per_slice = _cdiv(n_tiles, num_slices)
    total_tiles = num_slices * tiles_per_slice
    rows_p = total_tiles * tm
    needs_mask = rows_p != batch_size

    def prep_rows(a):
        a = a.astype(compute_dtype)
        if a.shape[0] != rows_p:
            a = jnp.pad(a, ((0, rows_p - a.shape[0]), (0, 0)))
        return a

    x_p = prep_rows(e_explicit)                                   # (rows_p, d_exp)
    # Interleave y / shuffled_y per tile: block g of (2*tm) rows holds the
    # joint rows of tile g followed by the marginal rows of tile g.
    y3 = prep_rows(e_implicit).reshape(total_tiles, tm, d_imp)
    ys3 = prep_rows(shuffled_y).reshape(total_tiles, tm, d_imp)
    yys_p = jnp.stack([y3, ys3], axis=1).reshape(total_tiles * 2 * tm, d_imp)

    # ---- weights: split W1 by feature block, pad hidden/output dims to 128 ----
    hp = _round_up(hidden, 128)
    op = 128
    w1x_p = _pad2d(w1[:d_exp], d_exp, hp).astype(compute_dtype)
    w1y_p = _pad2d(w1[d_exp:], d_imp, hp).astype(compute_dtype)
    w2_p = _pad2d(w2, hp, hp).astype(compute_dtype)
    w3_p = _pad2d(w3, hp, op).astype(compute_dtype)
    w3t_p = _pad2d(w3[:, 0][None, :], 1, hp)                       # f32, finalize only
    b1_p = _pad2d(b1[None, :], 1, hp)                              # biases stay f32
    b2_p = _pad2d(b2[None, :], 1, hp)
    b3_p = _pad2d(b3[None, :], 1, op)

    kernel = functools.partial(_mine_kernel, batch_size, tm, tiles_per_slice,
                               needs_mask)

    row_idx = lambda c, i: (c * tiles_per_slice + i, 0)
    const_idx = lambda c, i: (0, 0)

    out = pl.pallas_call(
        kernel,
        out_shape=jax.ShapeDtypeStruct((num_slices, 1, hp), jnp.float32),
        grid_spec=pltpu.PrefetchScalarGridSpec(
            num_scalar_prefetch=0,
            grid=(num_slices, tiles_per_slice),
            in_specs=[
                pl.BlockSpec((tm, d_exp), row_idx),          # x tile
                pl.BlockSpec((2 * tm, d_imp), row_idx),      # [y ; y_shuffled] tile
                pl.BlockSpec((d_exp, hp), const_idx),        # W1x
                pl.BlockSpec((d_imp, hp), const_idx),        # W1y
                pl.BlockSpec((1, hp), const_idx),            # b1
                pl.BlockSpec((hp, hp), const_idx),           # W2
                pl.BlockSpec((1, hp), const_idx),            # b2
                pl.BlockSpec((hp, op), const_idx),           # W3 (marginal head)
                pl.BlockSpec((1, hp), const_idx),            # W3[:,0] row (finalize)
                pl.BlockSpec((1, op), const_idx),            # b3
            ],
            out_specs=pl.BlockSpec((1, 1, hp), lambda c, i: (c, 0, 0)),
            scratch_shapes=[pltpu.VMEM((1, hp), jnp.float32),   # sum of joint h2 rows
                            pltpu.VMEM((1, 1), jnp.float32)],   # sum of exp(marginal)
        ),
        compiler_params=pltpu.CompilerParams(
            dimension_semantics=("parallel", "arbitrary")),
    )(x_p, yys_p, w1x_p, w1y_p, b1_p, w2_p, b2_p, w3_p, w3t_p, b3_p)

    # Combine the per-slice partial sums (tiny scalar work in plain JAX).
    inv_b = 1.0 / batch_size
    joint_sum = jnp.sum(out[:, 0, 0])
    exp_sum = jnp.sum(out[:, 0, 1])
    mean_joint = joint_sum * inv_b + b3[0].astype(jnp.float32)
    mean_exp = exp_sum * inv_b
    return LOG2E * (mean_joint - jnp.log(mean_exp))


def init_mine_params(key, dim_explicit, dim_implicit, hidden=50):
    """Deterministic init mimicking torch.nn.Linear (uniform +/- 1/sqrt(fan_in))."""
    d_in = dim_explicit + dim_implicit
    keys = jax.random.split(key, 6)

    def linear(kw, kb, fan_in, fan_out):
        bound = 1.0 / math.sqrt(fan_in)
        w = jax.random.uniform(kw, (fan_in, fan_out), jnp.float32, -bound, bound)
        b = jax.random.uniform(kb, (fan_out,), jnp.float32, -bound, bound)
        return w, b

    w1, b1 = linear(keys[0], keys[1], d_in, hidden)
    w2, b2 = linear(keys[2], keys[3], hidden, hidden)
    w3, b3 = linear(keys[4], keys[5], hidden, 1)
    return (w1, b1, w2, b2, w3, b3)


def mine_forward_ref(e_explicit, e_implicit, params, perm_key):
    """Pure-JAX reference (matches the PyTorch forward semantics)."""
    w1, b1, w2, b2, w3, b3 = params
    batch_size = e_explicit.shape[0]
    idx = jax.random.permutation(perm_key, batch_size)
    shuffled_y = e_implicit[idx]
    tiled_x = jnp.concatenate([e_explicit, e_explicit], axis=0)
    concat_y = jnp.concatenate([e_implicit, shuffled_y], axis=0)
    inputs = jnp.concatenate([tiled_x, concat_y], axis=1)
    hi = jax.lax.Precision.HIGHEST
    h1 = jnp.maximum(jnp.dot(inputs, w1, precision=hi) + b1, 0.0)
    h2 = jnp.maximum(jnp.dot(h1, w2, precision=hi) + b2, 0.0)
    logits = jnp.dot(h2, w3, precision=hi) + b3
    pred_xy = logits[:batch_size]
    pred_x_y = logits[batch_size:]
    return LOG2E * (jnp.mean(pred_xy) - jnp.log(jnp.mean(jnp.exp(pred_x_y))))


def _check(batch, dim_explicit, dim_implicit, seed, tile_rows=None,
           num_slices=None):
    key = jax.random.PRNGKey(seed)
    k_x, k_y, k_params, k_perm = jax.random.split(key, 4)
    e_explicit = jax.random.normal(k_x, (batch, dim_explicit), jnp.float32)
    e_implicit = jax.random.normal(k_y, (batch, dim_implicit), jnp.float32)
    params = init_mine_params(k_params, dim_explicit, dim_implicit)

    mi_kernel = jax.block_until_ready(
        mine_forward_pallas(e_explicit, e_implicit, params, k_perm,
                            tile_rows=tile_rows, num_slices=num_slices))
    mi_ref = jax.block_until_ready(
        mine_forward_ref(e_explicit, e_implicit, params, k_perm))

    assert jnp.allclose(mi_kernel, mi_ref, atol=2e-4, rtol=2e-4), (
        f"mismatch (batch={batch}): kernel={mi_kernel} ref={mi_ref}")


def _check_bf16(batch, dim_explicit, dim_implicit, seed):
    key = jax.random.PRNGKey(seed)
    k_x, k_y, k_params, k_perm = jax.random.split(key, 4)
    e_explicit = jax.random.normal(k_x, (batch, dim_explicit), jnp.float32)
    e_implicit = jax.random.normal(k_y, (batch, dim_implicit), jnp.float32)
    params = init_mine_params(k_params, dim_explicit, dim_implicit)

    mi_kernel = jax.block_until_ready(
        mine_forward_pallas(e_explicit, e_implicit, params, k_perm,
                            compute_dtype=jnp.bfloat16))
    mi_ref = jax.block_until_ready(
        mine_forward_ref(e_explicit, e_implicit, params, k_perm))
    assert bool(jnp.isfinite(mi_kernel)), "bf16 MI is not finite"
    assert abs(float(mi_kernel) - float(mi_ref)) < 0.1, (
        f"bf16 mismatch: kernel={mi_kernel} ref={mi_ref}")


if __name__ == "__main__":
    # Small shapes consistent with the module: batch=8, 16+16 features, hidden=50.
    _check(batch=8, dim_explicit=16, dim_implicit=16, seed=0)
    # Multi-tile accumulation + padded-row masking (batch not a multiple of the tile).
    _check(batch=20, dim_explicit=12, dim_implicit=20, seed=1, tile_rows=8)
    # Even tile count -> 2 "parallel" slices with per-slice partial sums.
    _check(batch=32, dim_explicit=16, dim_implicit=16, seed=2, tile_rows=8)
    # Forced 2 slices with a fully-padded trailing tile + a partial tile.
    _check(batch=24, dim_explicit=16, dim_implicit=16, seed=3, tile_rows=8,
           num_slices=2)
    # bf16 MXU operands (v6e/v7x fast path), f32 accumulation, loose tolerance.
    _check_bf16(batch=64, dim_explicit=16, dim_implicit=16, seed=4)
    print("KERNEL_OK")
</pallas_src>

<mosaic_0001>
module attributes {stable_mosaic.version = 11 : i64} {
  func.func @_mine_kernel(%arg0: i32, %arg1: i32, %arg2: memref<8x16xf32, #tpu.memory_space<vmem>>, %arg3: memref<16x16xf32, #tpu.memory_space<vmem>>, %arg4: memref<16x128xf32, #tpu.memory_space<vmem>>, %arg5: memref<16x128xf32, #tpu.memory_space<vmem>>, %arg6: memref<1x128xf32, #tpu.memory_space<vmem>>, %arg7: memref<128x128xf32, #tpu.memory_space<vmem>>, %arg8: memref<1x128xf32, #tpu.memory_space<vmem>>, %arg9: memref<128x128xf32, #tpu.memory_space<vmem>>, %arg10: memref<1x128xf32, #tpu.memory_space<vmem>>, %arg11: memref<1x128xf32, #tpu.memory_space<vmem>>, %arg12: memref<1x1x128xf32, #tpu.memory_space<vmem>>, %arg13: memref<1x128xf32, #tpu.memory_space<vmem>>, %arg14: memref<1x1xf32, #tpu.memory_space<vmem>>) attributes {dimension_semantics = [#tpu.dimension_semantics<parallel>, #tpu.dimension_semantics<arbitrary>], iteration_bounds = array<i64: 1, 1>, scalar_prefetch = 0 : i64, scratch_operands = 2 : i64, tpu.core_type = #tpu.core_type<tc>, window_params = [{transform_indices = @transform_0, window_bounds = array<i64: 8, 16>}, {transform_indices = @transform_1, window_bounds = array<i64: 16, 16>}, {pipeline_mode = #tpu.pipeline_mode<synchronous>, transform_indices = @transform_2, window_bounds = array<i64: 16, 128>}, {pipeline_mode = #tpu.pipeline_mode<synchronous>, transform_indices = @transform_3, window_bounds = array<i64: 16, 128>}, {pipeline_mode = #tpu.pipeline_mode<synchronous>, transform_indices = @transform_4, window_bounds = array<i64: 1, 128>}, {pipeline_mode = #tpu.pipeline_mode<synchronous>, transform_indices = @transform_5, window_bounds = array<i64: 128, 128>}, {pipeline_mode = #tpu.pipeline_mode<synchronous>, transform_indices = @transform_6, window_bounds = array<i64: 1, 128>}, {pipeline_mode = #tpu.pipeline_mode<synchronous>, transform_indices = @transform_7, window_bounds = array<i64: 128, 128>}, {pipeline_mode = #tpu.pipeline_mode<synchronous>, transform_indices = @transform_8, window_bounds = array<i64: 1, 128>}, {pipeline_mode = #tpu.pipeline_mode<synchronous>, transform_indices = @transform_9, window_bounds = array<i64: 1, 128>}, {transform_indices = @transform_10, window_bounds = array<i64: 1, 1, 128>}]} {
    %c0_i32 = arith.constant 0 : i32
    %0 = arith.cmpi eq, %arg1, %c0_i32 : i32
    %1 = arith.extui %0 : i1 to i32
    %c0_i32_0 = arith.constant 0 : i32
    %2 = arith.cmpi ne, %1, %c0_i32_0 : i32
    scf.if %2 {
      %cst_35 = arith.constant 0.000000e+00 : f32
      %45 = vector.broadcast %cst_35 : f32 to vector<1x128xf32>
      %c0_36 = arith.constant 0 : index
      %c0_37 = arith.constant 0 : index
      %46 = vector.load %arg13[%c0_36, %c0_37] : memref<1x128xf32, #tpu.memory_space<vmem>>, vector<1x128xf32>
      tpu.vector_store %arg13[%c0_36, %c0_37], %45 {strides = array<i32>} : memref<1x128xf32, #tpu.memory_space<vmem>>, vector<1x128xf32>,
      %cst_38 = arith.constant 0.000000e+00 : f32
      %47 = vector.broadcast %cst_38 : f32 to vector<1x1xf32>
      %c0_39 = arith.constant 0 : index
      %c0_40 = arith.constant 0 : index
      %48 = vector.load %arg14[%c0_39, %c0_40] : memref<1x1xf32, #tpu.memory_space<vmem>>, vector<1x1xf32>
      tpu.vector_store %arg14[%c0_39, %c0_40], %47 {strides = array<i32>} : memref<1x1xf32, #tpu.memory_space<vmem>>, vector<1x1xf32>,
    } else {
    }
    %c0 = arith.constant 0 : index
    %c0_1 = arith.constant 0 : index
    %3 = vector.load %arg2[%c0, %c0_1] : memref<8x16xf32, #tpu.memory_space<vmem>>, vector<8x16xf32>
    %c0_2 = arith.constant 0 : index
    %c0_3 = arith.constant 0 : index
    %4 = vector.load %arg4[%c0_2, %c0_3] : memref<16x128xf32, #tpu.memory_space<vmem>>, vector<16x128xf32>
    %cst = arith.constant dense<0.000000e+00> : vector<8x128xf32>
    %5 = tpu.matmul %3, %4, %cst {dimension_numbers = #tpu.dot_dimension_numbers<[1], [0], [0], [1], [0, 0, 1, 1], [], []>} : vector<8x16xf32>, vector<16x128xf32>, vector<8x128xf32> -> vector<8x128xf32>
    %c0_4 = arith.constant 0 : index
    %c0_5 = arith.constant 0 : index
    %6 = vector.load %arg3[%c0_4, %c0_5] : memref<16x16xf32, #tpu.memory_space<vmem>>, vector<16x16xf32>
    %c0_6 = arith.constant 0 : index
    %c0_7 = arith.constant 0 : index
    %7 = vector.load %arg5[%c0_6, %c0_7] : memref<16x128xf32, #tpu.memory_space<vmem>>, vector<16x128xf32>
    %cst_8 = arith.constant dense<0.000000e+00> : vector<16x128xf32>
    %8 = tpu.matmul %6, %7, %cst_8 {dimension_numbers = #tpu.dot_dimension_numbers<[1], [0], [0], [1], [0, 0, 1, 1], [], []>} : vector<16x16xf32>, vector<16x128xf32>, vector<16x128xf32> -> vector<16x128xf32>
    %c0_9 = arith.constant 0 : index
    %c0_10 = arith.constant 0 : index
    %9 = vector.load %arg6[%c0_9, %c0_10] : memref<1x128xf32, #tpu.memory_space<vmem>>, vector<1x128xf32>
    %10 = vector.broadcast %9 : vector<1x128xf32> to vector<8x128xf32>
    %11 = arith.addf %5, %10 : vector<8x128xf32>
    %12 = tpu.concatenate %11, %11 in 0 : vector<8x128xf32>, vector<8x128xf32> -> vector<16x128xf32>
    %13 = arith.addf %8, %12 : vector<16x128xf32>
    %cst_11 = arith.constant 0.000000e+00 : f32
    %14 = vector.broadcast %cst_11 : f32 to vector<16x128xf32>
    %15 = arith.maximumf %13, %14 : vector<16x128xf32>
    %c0_12 = arith.constant 0 : index
    %c0_13 = arith.constant 0 : index
    %16 = vector.load %arg7[%c0_12, %c0_13] : memref<128x128xf32, #tpu.memory_space<vmem>>, vector<128x128xf32>
    %cst_14 = arith.constant dense<0.000000e+00> : vector<16x128xf32>
    %17 = tpu.matmul %15, %16, %cst_14 {dimension_numbers = #tpu.dot_dimension_numbers<[1], [0], [0], [1], [0, 0, 1, 1], [], []>} : vector<16x128xf32>, vector<128x128xf32>, vector<16x128xf32> -> vector<16x128xf32>
    %c0_15 = arith.constant 0 : index
    %c0_16 = arith.constant 0 : index
    %18 = vector.load %arg8[%c0_15, %c0_16] : memref<1x128xf32, #tpu.memory_space<vmem>>, vector<1x128xf32>
    %19 = vector.broadcast %18 : vector<1x128xf32> to vector<16x128xf32>
    %20 = arith.addf %17, %19 : vector<16x128xf32>
    %cst_17 = arith.constant 0.000000e+00 : f32
    %21 = vector.broadcast %cst_17 : f32 to vector<16x128xf32>
    %22 = arith.maximumf %20, %21 : vector<16x128xf32>
    %23 = vector.extract_strided_slice %22 {offsets = [0, 0], sizes = [8, 128], strides = [1, 1]} : vector<16x128xf32> to vector<8x128xf32>
    %24 = vector.extract_strided_slice %22 {offsets = [8, 0], sizes = [8, 128], strides = [1, 1]} : vector<16x128xf32> to vector<8x128xf32>
    %c0_18 = arith.constant 0 : index
    %c0_19 = arith.constant 0 : index
    %25 = vector.load %arg9[%c0_18, %c0_19] : memref<128x128xf32, #tpu.memory_space<vmem>>, vector<128x128xf32>
    %cst_20 = arith.constant dense<0.000000e+00> : vector<8x128xf32>
    %26 = tpu.matmul %24, %25, %cst_20 {dimension_numbers = #tpu.dot_dimension_numbers<[1], [0], [0], [1], [0, 0, 1, 1], [], []>} : vector<8x128xf32>, vector<128x128xf32>, vector<8x128xf32> -> vector<8x128xf32>
    %27 = vector.extract_strided_slice %26 {offsets = [0, 0], sizes = [8, 1], strides = [1, 1]} : vector<8x128xf32> to vector<8x1xf32>
    %c0_21 = arith.constant 0 : index
    %c0_22 = arith.constant 0 : index
    %28 = vector.load %arg11[%c0_21, %c0_22] : memref<1x128xf32, #tpu.memory_space<vmem>>, vector<1x1xf32>
    %29 = vector.broadcast %28 : vector<1x1xf32> to vector<8x1xf32>
    %30 = arith.addf %27, %29 : vector<8x1xf32>
    %31 = math.exp %30 : vector<8x1xf32>
    %c0_23 = arith.constant 0 : index
    %c0_24 = arith.constant 0 : index
    %32 = vector.load %arg13[%c0_23, %c0_24] : memref<1x128xf32, #tpu.memory_space<vmem>>, vector<1x128xf32>
    %cst_25 = arith.constant dense<0.000000e+00> : vector<128xf32>
    %33 = vector.multi_reduction <add>, %23, %cst_25 [0] : vector<8x128xf32> to vector<128xf32>
    %34 = vector.shape_cast %33 : vector<128xf32> to vector<1x128xf32>
    %35 = arith.addf %32, %34 : vector<1x128xf32>
    %c0_26 = arith.constant 0 : index
    %c0_27 = arith.constant 0 : index
    %36 = vector.load %arg13[%c0_26, %c0_27] : memref<1x128xf32, #tpu.memory_space<vmem>>, vector<1x128xf32>
    tpu.vector_store %arg13[%c0_26, %c0_27], %35 {strides = array<i32>} : memref<1x128xf32, #tpu.memory_space<vmem>>, vector<1x128xf32>,
    %c0_28 = arith.constant 0 : index
    %c0_29 = arith.constant 0 : index
    %37 = vector.load %arg14[%c0_28, %c0_29] : memref<1x1xf32, #tpu.memory_space<vmem>>, vector<1x1xf32>
    %cst_30 = arith.constant dense<0.000000e+00> : vector<1xf32>
    %38 = vector.multi_reduction <add>, %31, %cst_30 [0] : vector<8x1xf32> to vector<1xf32>
    %39 = vector.shape_cast %38 : vector<1xf32> to vector<1x1xf32>
    %40 = arith.addf %37, %39 : vector<1x1xf32>
    %c0_31 = arith.constant 0 : index
    %c0_32 = arith.constant 0 : index
    %41 = vector.load %arg14[%c0_31, %c0_32] : memref<1x1xf32, #tpu.memory_space<vmem>>, vector<1x1xf32>
    tpu.vector_store %arg14[%c0_31, %c0_32], %40 {strides = array<i32>} : memref<1x1xf32, #tpu.memory_space<vmem>>, vector<1x1xf32>,
    %c0_i32_33 = arith.constant 0 : i32
    %42 = arith.cmpi eq, %arg1, %c0_i32_33 : i32
    %43 = arith.extui %42 : i1 to i32
    %c0_i32_34 = arith.constant 0 : i32
    %44 = arith.cmpi ne, %43, %c0_i32_34 : i32
    scf.if %44 {
      %c0_35 = arith.constant 0 : index
      %c0_36 = arith.constant 0 : index
      %45 = vector.load %arg13[%c0_35, %c0_36] : memref<1x128xf32, #tpu.memory_space<vmem>>, vector<1x128xf32>
      %c0_37 = arith.constant 0 : index
      %c0_38 = arith.constant 0 : index
      %46 = vector.load %arg10[%c0_37, %c0_38] : memref<1x128xf32, #tpu.memory_space<vmem>>, vector<1x128xf32>
      %47 = arith.mulf %45, %46 : vector<1x128xf32>
      %48 = vector.shape_cast %47 : vector<1x128xf32> to vector<1x1x128xf32>
      %cst_39 = arith.constant dense<0.000000e+00> : vector<1xf32>
      %49 = vector.multi_reduction <add>, %48, %cst_39 [1, 2] : vector<1x1x128xf32> to vector<1xf32>
      %50 = vector.shape_cast %49 : vector<1xf32> to vector<1x1x1xf32>
      %51 = vector.extract %50[0, 0, 0] : f32 from vector<1x1x1xf32>
      %52 = tpu.iota {dimensions = array<i32: 1>} : vector<1x128xi32>
      %c0_i32_40 = arith.constant 0 : i32
      %53 = vector.broadcast %c0_i32_40 : i32 to vector<1x128xi32>
      %54 = arith.cmpi eq, %52, %53 : vector<1x128xi32>
      %c1_i32 = arith.constant 1 : i32
      %55 = vector.broadcast %c1_i32 : i32 to vector<1x128xi32>
      %56 = arith.cmpi eq, %52, %55 : vector<1x128xi32>
      %c0_41 = arith.constant 0 : index
      %c0_42 = arith.constant 0 : index
      %57 = vector.load %arg14[%c0_41, %c0_42] : memref<1x1xf32, #tpu.memory_space<vmem>>, vector<1x1xf32>
      %cst_43 = arith.constant 0.000000e+00 : f32
      %58 = vector.shape_cast %57 : vector<1x1xf32> to vector<1x1xf32>
      %59 = vector.broadcast %58 : vector<1x1xf32> to vector<1x128xf32>
      %60 = vector.broadcast %cst_43 : f32 to vector<1x128xf32>
      %61 = arith.select %56, %59, %60 : vector<1x128xi1>, vector<1x128xf32>
      %62 = vector.broadcast %51 : f32 to vector<1x128xf32>
      %63 = arith.select %54, %62, %61 : vector<1x128xi1>, vector<1x128xf32>
      %64 = vector.shape_cast %63 : vector<1x128xf32> to vector<1x1x128xf32>
      %c0_44 = arith.constant 0 : index
      %c0_45 = arith.constant 0 : index
      %c0_46 = arith.constant 0 : index
      %65 = vector.load %arg12[%c0_44, %c0_45, %c0_46] : memref<1x1x128xf32, #tpu.memory_space<vmem>>, vector<1x1x128xf32>
      tpu.vector_store %arg12[%c0_44, %c0_45, %c0_46], %64 {strides = array<i32>} : memref<1x1x128xf32, #tpu.memory_space<vmem>>, vector<1x1x128xf32>,
    } else {
    }
    return
  }
  func.func @transform_0(%arg0: i32, %arg1: i32) -> (i32, i32) {
    %c1_i32 = arith.constant 1 : i32
    %0 = arith.muli %arg0, %c1_i32 : i32
    %1 = arith.addi %0, %arg1 : i32
    %c0_i32 = arith.constant 0 : i32
    %c0_i32_0 = arith.constant 0 : i32
    return %1, %c0_i32 : i32, i32
  }
  func.func @transform_1(%arg0: i32, %arg1: i32) -> (i32, i32) {
    %c1_i32 = arith.constant 1 : i32
    %0 = arith.muli %arg0, %c1_i32 : i32
    %1 = arith.addi %0, %arg1 : i32
    %c0_i32 = arith.constant 0 : i32
    %c0_i32_0 = arith.constant 0 : i32
    return %1, %c0_i32 : i32, i32
  }
  func.func @transform_2(%arg0: i32, %arg1: i32) -> (i32, i32) {
    %c0_i32 = arith.constant 0 : i32
    %c0_i32_0 = arith.constant 0 : i32
    %c0_i32_1 = arith.constant 0 : i32
    return %c0_i32, %c0_i32_0 : i32, i32
  }
  func.func @transform_3(%arg0: i32, %arg1: i32) -> (i32, i32) {
    %c0_i32 = arith.constant 0 : i32
    %c0_i32_0 = arith.constant 0 : i32
    %c0_i32_1 = arith.constant 0 : i32
    return %c0_i32, %c0_i32_0 : i32, i32
  }
  func.func @transform_4(%arg0: i32, %arg1: i32) -> (i32, i32) {
    %c0_i32 = arith.constant 0 : i32
    %c0_i32_0 = arith.constant 0 : i32
    %c0_i32_1 = arith.constant 0 : i32
    return %c0_i32, %c0_i32_0 : i32, i32
  }
  func.func @transform_5(%arg0: i32, %arg1: i32) -> (i32, i32) {
    %c0_i32 = arith.constant 0 : i32
    %c0_i32_0 = arith.constant 0 : i32
    %c0_i32_1 = arith.constant 0 : i32
    return %c0_i32, %c0_i32_0 : i32, i32
  }
  func.func @transform_6(%arg0: i32, %arg1: i32) -> (i32, i32) {
    %c0_i32 = arith.constant 0 : i32
    %c0_i32_0 = arith.constant 0 : i32
    %c0_i32_1 = arith.constant 0 : i32
    return %c0_i32, %c0_i32_0 : i32, i32
  }
  func.func @transform_7(%arg0: i32, %arg1: i32) -> (i32, i32) {
    %c0_i32 = arith.constant 0 : i32
    %c0_i32_0 = arith.constant 0 : i32
    %c0_i32_1 = arith.constant 0 : i32
    return %c0_i32, %c0_i32_0 : i32, i32
  }
  func.func @transform_8(%arg0: i32, %arg1: i32) -> (i32, i32) {
    %c0_i32 = arith.constant 0 : i32
    %c0_i32_0 = arith.constant 0 : i32
    %c0_i32_1 = arith.constant 0 : i32
    return %c0_i32, %c0_i32_0 : i32, i32
  }
  func.func @transform_9(%arg0: i32, %arg1: i32) -> (i32, i32) {
    %c0_i32 = arith.constant 0 : i32
    %c0_i32_0 = arith.constant 0 : i32
    %c0_i32_1 = arith.constant 0 : i32
    return %c0_i32, %c0_i32_0 : i32, i32
  }
  func.func @transform_10(%arg0: i32, %arg1: i32) -> (i32, i32, i32) {
    %c0_i32 = arith.constant 0 : i32
    %c0_i32_0 = arith.constant 0 : i32
    %c0_i32_1 = arith.constant 0 : i32
    return %arg0, %c0_i32, %c0_i32_0 : i32, i32, i32
  }
}

</mosaic_0001>

<bundles_post_ra>
// kernel: tpu_custom_call.1
= control target key start
LH: loop header
LB: loop body
LE: loop exit
PB: predicated region body
PF: predicated region fallthrough
CT: control target
= control target key end

     0   :  { %15 = vsyncpa [#allocation5], 0  ;;  %s1014_s0 = inlined_call_operand.hbm [shape: f32[8,16], index: 0, kind: input, shape index: {}]   ;;  %s1015_s1 = inlined_call_operand.hbm [shape: f32[16,16], index: 1, kind: input, shape index: {}]   ;;  %s1016_s2 = inlined_call_operand.hbm [shape: f32[16,128], index: 2, kind: input, shape index: {}]   ;;  %s1017_s3 = inlined_call_operand.hbm [shape: f32[16,128], index: 3, kind: input, shape index: {}]   ;;  %s1018_s4 = inlined_call_operand.vmem [shape: f32[1,128], index: 4, kind: input, shape index: {}]   ;;  %s1019_s5 = inlined_call_operand.hbm [shape: f32[128,128], index: 5, kind: input, shape index: {}]   ;;  %s1020_s6 = inlined_call_operand.vmem [shape: f32[1,128], index: 6, kind: input, shape index: {}]   ;;  %s1021_s7 = inlined_call_operand.hbm [shape: f32[128,128], index: 7, kind: input, shape index: {}]   ;;  %s1022_s8 = inlined_call_operand.vmem [shape: f32[1,128], index: 8, kind: input, shape index: {}]   ;;  %s1023_s9 = inlined_call_operand.vmem [shape: f32[1,128], index: 9, kind: input, shape index: {}]   ;;  %s1024_s10 = inlined_call_operand.hbm [shape: f32[1,1,128], index: 10, kind: output, shape index: {}]  }
   0x1   :  { %16 = vsyncpa [#allocation8], 0 }
   0x2   :  { %17 = vsyncpa [#allocation11], 0 }
   0x3   :  { %18 = vsyncpa [#allocation14], 0 }
   0x4   :  { %19 = vsyncpa [#allocation6], 0  ;;  %s873_s13 = smov [#allocation7]  }
   0x5   :  { %s42_s14 = sshll.u32 %s873_s13, 4  ;;  %s43_s14 = int_to_ptr.vmem [resolvable:$true] %s42_s14 }
   0x6   :  { %s731_s15 = scalar_lea.vmem %s43_s14, 256  ;;  %p736_p1 = scmp.lt.s32.totalorder %s43_s14, %s43_s14 }
   0x7   :  { %p732_p0 = scmp.ne.s32.totalorder %s43_s14, %s731_s15  ;;  %p737_p2 = scmp.lt.s32.totalorder %s731_s15, %s731_s15 }
   0x9   :  { %p738_p3 = por %p737_p2, %p736_p1 }
   0xb   :  { %p739_p4 = pnand %p738_p3, %p732_p0 }
   0xd   :  { %742 = shalt.err (!%p739_p4)
}
   0xe   :  { %s874_s16 = smov 128   ;;  %s875_s17 = smov 8  }
   0xf   :  { %48 = dma.hbm_to_vmem [thread:$0]  %s1015_s1, 256, %s43_s14, [#allocation8], %s874_s16, %s874_s16, %s875_s17  }
  0x10   :  { %s876_s20 = smov [#allocation10]   ;;  %s877_s22 = smov [#allocation4]  }
  0x11   :  { %s66_s21 = sshll.u32 %s876_s20, 4  ;;  %s29_s23 = sshll.u32 %s877_s22, 4  ;;  %s67_s21 = int_to_ptr.vmem [resolvable:$true] %s66_s21  ;;  %s30_s23 = int_to_ptr.vmem [resolvable:$true] %s29_s23 }
  0x12   :  { %s751_s24 = scalar_lea.vmem %s67_s21, 256  ;;  %p756_p6 = scmp.lt.s32.totalorder %s67_s21, %s67_s21 }
  0x13   :  { %p752_p5 = scmp.ne.s32.totalorder %s67_s21, %s751_s24  ;;  %p757_p7 = scmp.lt.s32.totalorder %s751_s24, %s751_s24 }
  0x15   :  { %p758_p8 = por %p757_p7, %p756_p6 }
  0x17   :  { %p759_p9 = pnand %p758_p8, %p752_p5 }
  0x19   :  { %762 = shalt.err (!%p759_p9)
}
  0x1a   :  { %72 = dma.hbm_to_vmem [thread:$0]  %s1017_s3, 256, %s67_s21, [#allocation11], %s874_s16, %s874_s16, %s875_s17  }
  0x1b   :  { %s771_s1 = scalar_lea.vmem %s30_s23, 128  ;;  %p776_p11 = scmp.lt.s32.totalorder %s30_s23, %s30_s23 }
  0x1c   :  { %p772_p10 = scmp.ne.s32.totalorder %s30_s23, %s771_s1  ;;  %p777_p12 = scmp.lt.s32.totalorder %s771_s1, %s771_s1 }
  0x1e   :  { %p778_p13 = por %p777_p12, %p776_p11 }
  0x20   :  { %p779_p0 = pnand %p778_p13, %p772_p10 }
  0x22   :  { %782 = shalt.err (!%p779_p0)
}
  0x23   :  { %32 = dma.hbm_to_vmem [thread:$0]  %s1014_s0, 128, %s30_s23, [#allocation5]  }
  0x24   :  { %s878_s29 = smov [#allocation9]   ;;  %s879_s11 = smov [#allocation12]  }
  0x25   :  { %s54_s30 = sshll.u32 %s878_s29, 4  ;;  %s80_s12 = sshll.u32 %s879_s11, 4  ;;  %s55_s30 = int_to_ptr.vmem [resolvable:$true] %s54_s30  ;;  %s81_s12 = int_to_ptr.vmem [resolvable:$true] %s80_s12 }
  0x26   :  { %s791_s13 = scalar_lea.vmem %s55_s30, 256  ;;  %p796_p2 = scmp.lt.s32.totalorder %s55_s30, %s55_s30 }
  0x27   :  { %p792_p1 = scmp.ne.s32.totalorder %s55_s30, %s791_s13  ;;  %p797_p3 = scmp.lt.s32.totalorder %s791_s13, %s791_s13 }
  0x29   :  { %p798_p4 = por %p797_p3, %p796_p2 }
  0x2b   :  { %p799_p5 = pnand %p798_p4, %p792_p1 }
  0x2d   :  { %802 = shalt.err (!%p799_p5)
}
  0x2e   :  { %60 = dma.hbm_to_vmem [thread:$0]  %s1016_s2, 256, %s55_s30, [#allocation8], %s874_s16, %s874_s16, %s875_s17  }
  0x2f   :  { %s811_s0 = scalar_lea.vmem %s81_s12, 2048  ;;  %p816_p7 = scmp.lt.s32.totalorder %s81_s12, %s81_s12 }
  0x30   :  { %p812_p6 = scmp.ne.s32.totalorder %s81_s12, %s811_s0  ;;  %p817_p8 = scmp.lt.s32.totalorder %s811_s0, %s811_s0 }
  0x32   :  { %p818_p9 = por %p817_p8, %p816_p7 }
  0x34   :  { %p819_p10 = pnand %p818_p9, %p812_p6 }
  0x36   :  { %822 = shalt.err (!%p819_p10)
}
  0x37   :  { %86 = dma.hbm_to_vmem [thread:$0]  %s1019_s5, 2048, %s81_s12, [#allocation11], %s874_s16, %s874_s16, %s875_s17  }
  0x38   :  { %s880_s19 = smov [#allocation13]  }
  0x39   :  { %s94_s20 = sshll.u32 %s880_s19, 4  ;;  %s95_s20 = int_to_ptr.vmem [resolvable:$true] %s94_s20 }
  0x3a   :  { %s831_s21 = scalar_lea.vmem %s95_s20, 2048  ;;  %p836_p12 = scmp.lt.s32.totalorder %s95_s20, %s95_s20 }
  0x3b   :  { %p832_p11 = scmp.ne.s32.totalorder %s95_s20, %s831_s21  ;;  %p837_p13 = scmp.lt.s32.totalorder %s831_s21, %s831_s21 }
  0x3d   :  { %p838_p0 = por %p837_p13, %p836_p12 }
  0x3f   :  { %p839_p1 = pnand %p838_p0, %p832_p11 }
  0x41   :  { %842 = shalt.err (!%p839_p1)
}
  0x42   :  { %100 = dma.hbm_to_vmem [thread:$0]  %s1021_s7, 2048, %s95_s20, [#allocation14], %s874_s16, %s874_s16, %s875_s17  }
  0x43   :  { %863 = dma.done.wait [#allocation5], 128  }
  0x44   :  { %864 = vsyncadd [#allocation5], 4294967168 }
  0x45   :  { %865 = dma.done.wait [#allocation8], 512  }
  0x46   :  { %866 = vsyncadd [#allocation8], 4294966784 }
  0x47   :  { %867 = dma.done.wait [#allocation11], 2304  }
  0x48   :  { %868 = vsyncadd [#allocation11], 4294964992 }
  0x49   :  { %869 = dma.done.wait [#allocation14], 2048  }
  0x4a   :  { %870 = vsyncadd [#allocation14], 4294965248  ;;  %v881_v0 = vmov 0.0   ;;  %vm882_vm0 = vmmov 0   ;;  %v135_v1 = vld [vmem:[#allocation9 + $0x8] sm:$0xff]  ;;  %v139_v2 = vld [vmem:[#allocation10 + $0x8] sm:$0xff] }
  0x4b   :  { %622 = vmatprep.subr.mxu0 %v881_v0  ;;  %130 = vst [vmem:[#allocation2] sm:$0x1] %v881_v0  ;;  %626 = vmatprep.mubr.msk.f32.mxu0 %vm882_vm0, %v881_v0  ;;  %v134_v3 = vld [vmem:[#allocation9] sm:$0xff]  ;;  %v138_v4 = vld [vmem:[#allocation10] sm:$0xff]  ;;  %v133_v5 = vld [vmem:[#allocation4] sm:$0xff]  ;;  %vm147_vm1 = vcmask 130048  }
  0x4c   :  { %623 = vmatpush3.msra.mxu0 %v135_v1  ;;  %629 = vmatprep.subr.mxu1 %v139_v2  ;;  %v136_v6 = vld [vmem:[#allocation7] sm:$0xff]  ;;  %v319_v7 = vld [vmem:[#allocation12 + $0x78] sm:$0xff]  ;;  %v317_v10 = vld [vmem:[#allocation12 + $0x68] sm:$0xff]  ;;  %vm527_vm2 = vcmask 1040384   ;;  %vm131_vm3 = vcmask 0   ;;  %vm510_vm4 = vcmask 7168  }
  0x4d   :  { %624 = vmatprep.subr.mxu0 %v881_v0  ;;  %630 = vmatpush3.msra.mxu1 %v139_v2  ;;  %v137_v8 = vld [vmem:[#allocation7 + $0x8] sm:$0xff]  ;;  %v318_v9 = vld [vmem:[#allocation12 + $0x70] sm:$0xff]  ;;  %v316_v11 = vld [vmem:[#allocation12 + $0x60] sm:$0xff]  ;;  %132 = vst.msk [vmem:[#allocation3] sm:$0x1] %vm131_vm3, %v881_v0  ;;  %s884_s24 = smov [#allocation15]  }
  0x4e   :  { %625 = vmatpush3.msra.mxu0 %v134_v3  ;;  %631 = vmatprep.subr.mxu1 %v138_v4  ;;  %v315_v12 = vld [vmem:[#allocation12 + $0x58] sm:$0xff]  ;;  %v314_v13 = vld [vmem:[#allocation12 + $0x50] sm:$0xff]  ;;  %v313_v14 = vld [vmem:[#allocation12 + $0x48] sm:$0xff]  ;;  %s562_s25 = sshll.u32 %s884_s24, 4  ;;  %s563_s25 = int_to_ptr.vmem [resolvable:$true] %s562_s25 }
  0x4f   :  { %627 = vmatmul.mubr.msk.f32.vlgmr.msra.gmra.mxu0 %vm147_vm1, %v133_v5  ;;  %632 = vmatpush3.msra.mxu1 %v138_v4  ;;  %v312_v15 = vld [vmem:[#allocation12 + $0x40] sm:$0xff]  ;;  %v311_v16 = vld [vmem:[#allocation12 + $0x38] sm:$0xff]  ;;  %v310_v17 = vld [vmem:[#allocation12 + $0x30] sm:$0xff]  ;;  %s843_s26 = scalar_lea.vmem %s563_s25, 16  ;;  %s847_s1 = scalar_lea.vmem %s563_s25, 32 }
  0x50   :  { %633 = vmatprep.mubr.msk.f32.mxu1 %vm147_vm1, %v136_v6  ;;  %636 = vmatprep.subr.mxu0 %v319_v7  ;;  %v309_v18 = vld [vmem:[#allocation12 + $0x28] sm:$0xff]  ;;  %v308_v19 = vld [vmem:[#allocation12 + $0x20] sm:$0xff]  ;;  %v307_v20 = vld [vmem:[#allocation12 + $0x18] sm:$0xff]  ;;  %v883_v6 = vmov 0   ;;  %p844_p2 = scmp.ne.s32.totalorder %s563_s25, %s843_s26  ;;  %p848_p3 = scmp.lt.s32.totalorder %s563_s25, %s563_s25 }
  0x51   :  { %634 = vmatmul.mubr.msk.f32.vlgmr.msra.gmra.mxu1 %vm147_vm1, %v137_v8  ;;  %637 = vmatpush3.msra.mxu0 %v319_v7  ;;  %v306_v21 = vld [vmem:[#allocation12 + $0x10] sm:$0xff]  ;;  %v305_v22 = vld [vmem:[#allocation12 + $0x8] sm:$0xff]  ;;  %v304_v23 = vld [vmem:[#allocation12] sm:$0xff]  ;;  %p849_p4 = scmp.lt.s32.totalorder %s847_s1, %s843_s26 }
  0x52   :  { %638 = vmatprep.subr.mxu0 %v318_v9  ;;  %671 = vmatprep.subr.mxu1 %v881_v0  ;;  %v419_v24 = vld [vmem:[#allocation13 + $0x78] sm:$0xff]  ;;  %v418_v25 = vld [vmem:[#allocation13 + $0x70] sm:$0xff]  ;;  %v417_v26 = vld [vmem:[#allocation13 + $0x68] sm:$0xff] }
  0x53   :  { %639 = vmatpush3.msra.mxu0 %v318_v9  ;;  %703 = vmatprep.mubr.msk.f32.mxu1 %vm882_vm0, %v881_v0  ;;  %v416_v27 = vld [vmem:[#allocation13 + $0x60] sm:$0xff]  ;;  %v415_v28 = vld [vmem:[#allocation13 + $0x58] sm:$0xff]  ;;  %v414_v29 = vld [vmem:[#allocation13 + $0x50] sm:$0xff]  ;;  %p850_p5 = por %p849_p4, %p848_p3 }
  0x54   :  { %640 = vmatprep.subr.mxu0 %v317_v10  ;;  %672 = vmatpush3.msra.mxu1 %v419_v24  ;;  %v413_v30 = vld [vmem:[#allocation13 + $0x48] sm:$0xff]  ;;  %v412_v31 = vld [vmem:[#allocation13 + $0x40] sm:$0xff]  ;;  %v411_v32 = vld [vmem:[#allocation13 + $0x38] sm:$0xff] }
  0x55   :  { %641 = vmatpush3.msra.mxu0 %v317_v10  ;;  %673 = vmatprep.subr.mxu1 %v881_v0  ;;  %v410_v33 = vld [vmem:[#allocation13 + $0x30] sm:$0xff]  ;;  %v409_v34 = vld [vmem:[#allocation13 + $0x28] sm:$0xff]  ;;  %v408_v35 = vld [vmem:[#allocation13 + $0x20] sm:$0xff]  ;;  %p851_p6 = pnand %p850_p5, %p844_p2 }
  0x56   :  { %642 = vmatprep.subr.mxu0 %v316_v11  ;;  %674 = vmatpush3.msra.mxu1 %v418_v25  ;;  %v407_v36 = vld [vmem:[#allocation13 + $0x18] sm:$0xff]  ;;  %v574_v37 = vld [vmem:[%s1018_s4] ss:$0 sm:$0xff]  ;;  %v406_v47 = vld [vmem:[#allocation13 + $0x10] sm:$0xff] }
  0x57   :  { %643 = vmatpush3.msra.mxu0 %v316_v11  ;;  %675 = vmatprep.subr.mxu1 %v881_v0  ;;  %v405_v48 = vld [vmem:[#allocation13 + $0x8] sm:$0xff]  ;;  %v404_v49 = vld [vmem:[#allocation13] sm:$0xff] }
  0x58   :  { %644 = vmatprep.subr.mxu0 %v315_v12  ;;  %676 = vmatpush3.msra.mxu1 %v417_v26  ;;  %v578_v50 = vld [vmem:[%s1020_s6] ss:$0 sm:$0xff]  ;;  %v509_v25 = vld [vmem:[#allocation3] sm:$0x1] }
  0x59   :  { %645 = vmatpush3.msra.mxu0 %v315_v12  ;;  %677 = vmatprep.subr.mxu1 %v881_v0  ;;  %v500_v62 = vld [vmem:[#allocation2] sm:$0x1] }
  0x5a   :  { %646 = vmatprep.subr.mxu0 %v314_v13  ;;  %678 = vmatpush3.msra.mxu1 %v416_v27  ;;  %v525_v2 = vld [vmem:[%s1022_s8] sm:$0x1] }
  0x5b   :  { %647 = vmatpush3.msra.mxu0 %v314_v13  ;;  %679 = vmatprep.subr.mxu1 %v881_v0 }
  0x5c   :  { %648 = vmatprep.subr.mxu0 %v313_v14  ;;  %680 = vmatpush3.msra.mxu1 %v415_v28 }
  0x5d   :  { %649 = vmatpush3.msra.mxu0 %v313_v14  ;;  %681 = vmatprep.subr.mxu1 %v881_v0  ;;  %v579_v14 = vld [vmem:[%s1023_s9] ss:$0 sm:$0xff] }
  0x5e   :  { %650 = vmatprep.subr.mxu0 %v312_v15  ;;  %682 = vmatpush3.msra.mxu1 %v414_v29  ;;  %v538_v29 = vlaneseq }
  0x5f   :  { %651 = vmatpush3.msra.mxu0 %v312_v15  ;;  %683 = vmatprep.subr.mxu1 %v881_v0 }
  0x60   :  { %652 = vmatprep.subr.mxu0 %v311_v16  ;;  %684 = vmatpush3.msra.mxu1 %v413_v30  ;;  %v549_v30 = vshrl.u32 %v538_v29, 7 }
  0x61   :  { %653 = vmatpush3.msra.mxu0 %v311_v16  ;;  %685 = vmatprep.subr.mxu1 %v881_v0 }
  0x62   :  { %654 = vmatprep.subr.mxu0 %v310_v17  ;;  %686 = vmatpush3.msra.mxu1 %v412_v31  ;;  %v539_v31 = vand.u32 127, %v538_v29 }
  0x63   :  { %655 = vmatpush3.msra.mxu0 %v310_v17  ;;  %687 = vmatprep.subr.mxu1 %v881_v0 }
  0x64   :  { %656 = vmatprep.subr.mxu0 %v309_v18  ;;  %688 = vmatpush3.msra.mxu1 %v411_v32  ;;  %v550_v32 = vsub.s32 0, %v549_v30  ;;  %vm541_vm5 = vcmp.eq.s32.totalorder %v539_v31, 1  ;;  %vm540_vm6 = vcmp.eq.s32.totalorder %v539_v31, 0 }
  0x65   :  { %657 = vmatpush3.msra.mxu0 %v309_v18  ;;  %689 = vmatprep.subr.mxu1 %v881_v0 }
  0x66   :  { %658 = vmatprep.subr.mxu0 %v308_v19  ;;  %690 = vmatpush3.msra.mxu1 %v410_v33 }
  0x67   :  { %659 = vmatpush3.msra.mxu0 %v308_v19  ;;  %691 = vmatprep.subr.mxu1 %v881_v0 }
  0x68   :  { %660 = vmatprep.subr.mxu0 %v307_v20  ;;  %692 = vmatpush3.msra.mxu1 %v409_v34 }
  0x69   :  { %661 = vmatpush3.msra.mxu0 %v307_v20  ;;  %693 = vmatprep.subr.mxu1 %v881_v0 }
  0x6a   :  { %662 = vmatprep.subr.mxu0 %v306_v21  ;;  %694 = vmatpush3.msra.mxu1 %v408_v35 }
  0x6b   :  { %663 = vmatpush3.msra.mxu0 %v306_v21  ;;  %695 = vmatprep.subr.mxu1 %v881_v0 }
  0x6c   :  { %664 = vmatprep.subr.mxu0 %v305_v22  ;;  %696 = vmatpush3.msra.mxu1 %v407_v36 }
  0x6d   :  { %665 = vmatpush3.msra.mxu0 %v305_v22  ;;  %697 = vmatprep.subr.mxu1 %v881_v0 }
  0x6e   :  { %666 = vmatprep.subr.mxu0 %v304_v23  ;;  %698 = vmatpush3.msra.mxu1 %v406_v47 }
  0x6f   :  { %667 = vmatpush3.msra.mxu0 %v304_v23  ;;  %699 = vmatprep.subr.mxu1 %v881_v0 }
  0x70   :  { %700 = vmatpush3.msra.mxu1 %v405_v48  ;;  %720 = vset.pattern.permute.xlu0 %v883_v6 }
  0x71   :  { %701 = vmatprep.subr.mxu1 %v881_v0 }
  0x72   :  { %702 = vmatpush3.msra.mxu1 %v404_v49 }
 0x10f   :  { %v217_v38 = vpop.f32.mrf.mxu0 }
 0x110   :  { %v218_v39 = vadd.f32 %v574_v37, %v217_v38 }
 0x111   :  { %v635_v40 = vpop.f32.mrf.mxu1  ;;  %v628_v41 = vpop.f32.mrf.mxu0 }
 0x112   :  { %v299_v42 = vadd.f32 %v635_v40, %v218_v39 }
 0x113   :  { %v293_v43 = vpop.f32.mrf.mxu1 }
 0x114   :  { %v294_v44 = vadd.f32 %v293_v43, %v218_v39  ;;  %v303_v46 = vmax.f32 %v299_v42, 0.0 }
 0x116   :  { %v302_v45 = vmax.f32 %v294_v44, 0.0 }
 0x118   :  { %668 = vmatprep.mubr.f32.mxu0 %v302_v45 }
 0x119   :  { %669 = vmatmul.mubr.f32.vlgmr.msra.gmra.mxu0 %v303_v46 }
 0x1d9   :  { %v670_v51 = vpop.f32.mrf.mxu0 }
 0x1da   :  { %v399_v52 = vadd.f32 %v670_v51, %v578_v50 }
 0x1db   :  { %v393_v53 = vpop.f32.mrf.mxu0 }
 0x1dc   :  { %v403_v54 = vmax.f32 %v399_v52, 0.0  ;;  %v394_v55 = vadd.f32 %v578_v50, %v393_v53 }
 0x1de   :  { %v402_v56 = vmax.f32 %v394_v55, 0.0  ;;  %704 = vmatmul.mubr.f32.vlgmr.msra.gmra.mxu1 %v403_v54 }
 0x1e0   :  { %v501_v57 = vrot.slane %v402_v56, 4 }
 0x1e2   :  { %v502_v58 = vadd.f32 %v501_v57, %v402_v56 }
 0x1e4   :  { %v503_v59 = vrot.slane %v502_v58, 2 }
 0x1e6   :  { %v504_v60 = vadd.f32 %v503_v59, %v502_v58 }
 0x1e8   :  { %v505_v61 = vrot.slane %v504_v60, 1 }
 0x1ea   :  { %v506_v63 = vadd.f32 %v505_v61, %v504_v60 }
 0x1ec   :  { %v507_v1 = vadd.f32 %v506_v63, %v500_v62 }
 0x1ee   :  { %508 = vst [vmem:[#allocation2] sm:$0x1] %v507_v1 }
 0x1f5   :  { %v524_v3 = vld [vmem:[#allocation2] sm:$0x1] }
 0x1f6   :  { %v526_v4 = vmul.f32 %v525_v2, %v524_v3 }
 0x1f8   :  { %v528_v5 = vsel %vm527_vm2, %v526_v4, 0.0 }
 0x1f9   :  { %529 = vadd.xlane.f32.xlu0 %v528_v5 }
 0x282   :  { %v530_v7 = vpop.xlane.xlu0 %529 }
 0x283   :  { %v531_v8 = vrot.slane %v530_v7, 4 }
 0x285   :  { %v532_v9 = vadd.f32 %v531_v8, %v530_v7 }
 0x287   :  { %v533_v10 = vrot.slane %v532_v9, 2 }
 0x289   :  { %v534_v11 = vadd.f32 %v533_v10, %v532_v9 }
 0x28b   :  { %v535_v12 = vrot.slane %v534_v11, 1 }
 0x28d   :  { %v536_v13 = vadd.f32 %v535_v12, %v534_v11 }
 0x28f   :  { %706 = vpush %v536_v13 }
 0x29e   :  { %v486_v15 = vpop.f32.mrf.mxu1 }
 0x29f   :  { %v497_v16 = vadd.f32 %v579_v14, %v486_v15 }
 0x2a0   :  { %v705_v17 = vpop.f32.mrf.mxu1 }
 0x2a1   :  { %v498_v18 = vmul.f32 1.442695, %v497_v16 }
 0x2a3   :  { %721 = vpow2.f32 %v498_v18 }
 0x2b0   :  { %v722_v0 = vpop.eup %721 }
 0x2b1   :  { %v511_v19 = vsel %vm510_vm4, %v722_v0, 0.0 }
 0x2b2   :  { %v512_v20 = vrot.slane %v511_v19, 4 }
 0x2b4   :  { %v513_v21 = vadd.f32 %v512_v20, %v511_v19 }
 0x2b6   :  { %v514_v22 = vrot.slane %v513_v21, 2 }
 0x2b8   :  { %v515_v23 = vadd.f32 %v514_v22, %v513_v21 }
 0x2ba   :  { %v516_v24 = vrot.slane %v515_v23, 1 }
 0x2bc   :  { %v517_v26 = vadd.f32 %v516_v24, %v515_v23 }
 0x2be   :  { %v518_v27 = vadd.f32 %v517_v26, %v509_v25 }
 0x2c0   :  { %520 = vst.msk [vmem:[#allocation3] sm:$0x1] %vm131_vm3, %v518_v27  ;;  %s707_s9 = spop %706 }
 0x2c1   :  { %v553_v35 = vstv %s707_s9 }
 0x2c7   :  { %v542_v28 = vld [vmem:[#allocation3] sm:$0x1] }
 0x2c8   :  { %545 = vperm.xlu0 %720, %v542_v28  }
 0x343   :  { %v546_v33 = vpop.permute.xlu0 %545 }
 0x344   :  { %v551_v34 = vrot.slane %v546_v33, %v550_v32 }
 0x346   :  { %v552_v36 = vsel %vm541_vm5, %v551_v34, 0.0 }
 0x347   :  { %v554_v37 = vsel %vm540_vm6, %v553_v35, %v552_v36 }
 0x348   :  { %555 = vst [vmem:[#allocation15] sm:$0x1] %v554_v37 }
 0x349   :  { %854 = shalt.err (!%p851_p6)
}
 0x34a   :  { %565 = dma.vmem_to_hbm [thread:$0]  %s563_s25, 16, %s1024_s10, [#allocation6]  }
 0x34b   :  { %871 = dma.done.wait [#allocation6], 16  }
 0x34c   :  { %872 = vsyncadd [#allocation6], 4294967280 }
 0x34d   :  { %569 = vsyncpa [#allocation5], 1 }
 0x34e   :  { %570 = vsyncpa [#allocation8], 1 }
 0x34f   :  { %571 = vsyncpa [#allocation11], 1 }
 0x350   :  { %572 = vsyncpa [#allocation14], 1 }
 0x351   :  { %573 = vsyncpa [#allocation6], 1 }

</bundles_post_ra>
